<compile_context>
chip_gen: v5e
topology: v5e:2x2
jax: 0.10.0
libtpu: 0.0.40
codegen_flags: <defaults>
</compile_context>

<pallas_src>
import functools

import jax
import jax.numpy as jnp
from jax.experimental import pallas as pl
from jax.experimental.pallas import tpu as pltpu

LANE = 128


def _tpu_tiling_params():
    """Returns (num_core_shards, max_block_rows) for the attached TPU."""
    kind = ""
    try:
        kind = jax.devices()[0].device_kind.lower()
    except Exception:
        pass
    if "v7" in kind or "7x" in kind:
        # 2 TensorCores, fast HBM: big blocks + 2-way core split.
        # 3 inputs x 2 bufs x 4 MiB = 24 MiB < 32 MiB default scoped VMEM.
        return 2, 8192
    if "v6" in kind:
        return 1, 8192          # single TC, 32 MiB default scoped VMEM
    # v5e / v5p / unknown: stay under the 16 MiB default scoped VMEM.
    return 1, 4096              # 3 inputs x 2 bufs x 2 MiB = 12 MiB


def _pixel_loss_kernel(x_ref, gt_ref, m_ref, num_ref, den_ref, *,
                       p, steps, num_blocks, partial_last, has_phantom,
                       last_block_valid_rows):
    c = pl.program_id(0)     # core shard ("parallel")
    i = pl.program_id(1)     # streaming / reduction step ("arbitrary")
    blk = c * steps + i      # logical block id (>= num_blocks only on phantom steps)

    @pl.when(i == 0)
    def _():
        num_ref[...] = jnp.zeros_like(num_ref)
        den_ref[...] = jnp.zeros_like(den_ref)

    # Stream native dtypes from HBM; do the math in f32 (VPU slack is free on
    # a mem-bound kernel).
    x = x_ref[...].astype(jnp.float32)
    g = gt_ref[...].astype(jnp.float32)
    m = m_ref[...].astype(jnp.float32)

    d = (x - g) * m
    val = jnp.abs(d) if p == 1 else d * d

    def accum(v, mm):
        # Per-lane partials only; the cross-lane reduce happens once, in the
        # wrapper.  Accumulators are resident in VMEM across the i axis.
        num_ref[...] += jnp.sum(v, axis=0, keepdims=True)
        den_ref[...] += jnp.sum(mm, axis=0, keepdims=True)

    if not (partial_last or has_phantom):
        # Every block is real and fully valid: pure fast path.
        accum(val, m)
    else:
        fast_limit = num_blocks - 1 if partial_last else num_blocks

        @pl.when(blk < fast_limit)
        def _():
            accum(val, m)

        if partial_last:
            @pl.when(blk == num_blocks - 1)
            def _():
                # Only the last real block pays for the row mask; the limit is
                # a compile-time constant.
                rid = jax.lax.broadcasted_iota(jnp.int32, val.shape, 0)
                keep = rid < last_block_valid_rows
                accum(jnp.where(keep, val, 0.0), jnp.where(keep, m, 0.0))
        # Phantom steps (blk >= num_blocks) fall through: they contribute
        # nothing and their clamped DMA re-targets the block already in VMEM,
        # so no data is re-read.


@functools.partial(jax.jit, static_argnums=(3,))
def pixel_loss(x, gt, mask, p):
    """x, gt, mask: same-shape arrays (e.g. NCHW). p in {1, 2}. Scalar f32.

    Note: if sum(mask) == 0 the result is inf/nan, matching the PyTorch ref.
    """
    assert p in (1, 2)
    assert x.shape == gt.shape == mask.shape
    channels = x.shape[1]

    # Stream bool masks as int8 (1 byte/elem); never upcast to f32 in HBM.
    if mask.dtype == jnp.bool_:
        mask = mask.astype(jnp.int8)

    n = x.size
    # Flatten: reshape of a contiguous array is free (no HBM copy).
    xf = x.reshape(-1)
    gf = gt.reshape(-1)
    mf = mask.reshape(-1)

    rows = n // LANE
    rem = n - rows * LANE

    # Ragged tail (< 128 elements): tiny pure-JAX reduction -- no full-array pad.
    if rem:
        xt = xf[rows * LANE:].astype(jnp.float32)
        gtt = gf[rows * LANE:].astype(jnp.float32)
        mt = mf[rows * LANE:].astype(jnp.float32)
        dt = (xt - gtt) * mt
        tail_num = jnp.sum(jnp.abs(dt) if p == 1 else dt * dt)
        tail_den = jnp.sum(mt)
    else:
        tail_num = jnp.float32(0.0)
        tail_den = jnp.float32(0.0)

    if rows == 0:
        return (tail_num / tail_den / channels).astype(jnp.float32)

    if rem:
        # Rare ragged case: prefix slice of the bulk region (may materialize a
        # copy, but still cheaper than padding + re-reading the whole arrays).
        xf = xf[: rows * LANE]
        gf = gf[: rows * LANE]
        mf = mf[: rows * LANE]

    x2 = xf.reshape(rows, LANE)
    g2 = gf.reshape(rows, LANE)
    m2 = mf.reshape(rows, LANE)

    num_cores, max_block_rows = _tpu_tiling_params()

    block_rows = rows if rows <= max_block_rows else max_block_rows
    num_blocks = pl.cdiv(rows, block_rows)
    num_cores = min(num_cores, num_blocks)
    steps = pl.cdiv(num_blocks, num_cores)

    partial_last = (num_blocks * block_rows) != rows
    has_phantom = (num_cores * steps) != num_blocks
    last_block_valid_rows = rows - (num_blocks - 1) * block_rows

    if has_phantom:
        def in_map(c, i):
            # Phantom steps clamp onto the core's previous block -> DMA elided.
            return (jnp.minimum(c * steps + i, num_blocks - 1), 0)
    else:
        def in_map(c, i):
            return (c * steps + i, 0)

    in_spec = pl.BlockSpec((block_rows, LANE), in_map)
    out_spec = pl.BlockSpec((None, 1, LANE), lambda c, i: (c, 0, 0))

    bytes_accessed = (x2.size * x2.dtype.itemsize
                      + g2.size * g2.dtype.itemsize
                      + m2.size * m2.dtype.itemsize
                      + 2 * num_cores * LANE * 4)
    cost = pl.CostEstimate(flops=5 * rows * LANE, transcendentals=0,
                           bytes_accessed=bytes_accessed)

    num, den = pl.pallas_call(
        functools.partial(
            _pixel_loss_kernel,
            p=p,
            steps=steps,
            num_blocks=num_blocks,
            partial_last=partial_last,
            has_phantom=has_phantom,
            last_block_valid_rows=last_block_valid_rows,
        ),
        out_shape=(
            jax.ShapeDtypeStruct((num_cores, 1, LANE), jnp.float32),
            jax.ShapeDtypeStruct((num_cores, 1, LANE), jnp.float32),
        ),
        grid_spec=pltpu.PrefetchScalarGridSpec(
            num_scalar_prefetch=0,
            grid=(num_cores, steps),
            in_specs=[in_spec, in_spec, in_spec],
            out_specs=[out_spec, out_spec],
        ),
        compiler_params=pltpu.CompilerParams(
            dimension_semantics=("parallel", "arbitrary"),
        ),
        cost_estimate=cost,
    )(x2, g2, m2)

    total_num = jnp.sum(num) + tail_num
    total_den = jnp.sum(den) + tail_den
    return (total_num / total_den / channels).astype(jnp.float32)


if __name__ == "__main__":
    key = jax.random.PRNGKey(0)
    kx, kg, km = jax.random.split(key, 3)

    def ref_loss(x, gt, mask, p):
        diff = (x - gt) * mask.astype(x.dtype)
        return (jnp.sum(jnp.abs(diff) ** p)
                / jnp.sum(mask.astype(jnp.float32)) / x.shape[1])

    # Case 1: f32 mask, lane-divisible element count (2*4*16*16 = 2048).
    N, C, H, W = 2, 4, 16, 16
    x = jax.random.normal(kx, (N, C, H, W), dtype=jnp.float32)
    gt = jax.random.normal(kg, (N, C, H, W), dtype=jnp.float32)
    mask = (jax.random.uniform(km, (N, C, H, W)) > 0.5).astype(jnp.float32)
    for p in (1, 2):
        out = jax.block_until_ready(pixel_loss(x, gt, mask, p))
        ref = ref_loss(x, gt, mask, p)
        assert jnp.allclose(out, ref, rtol=1e-5, atol=1e-6), (p, out, ref)

    # Case 2: bool mask streamed as int8 (2*4*16*32 = 4096 elements).
    N, C, H, W = 2, 4, 16, 32
    xb = jax.random.normal(kx, (N, C, H, W), dtype=jnp.float32)
    gb = jax.random.normal(kg, (N, C, H, W), dtype=jnp.float32)
    mb = jax.random.uniform(km, (N, C, H, W)) > 0.5
    out = jax.block_until_ready(pixel_loss(xb, gb, mb, 2))
    ref = ref_loss(xb, gb, mb, 2)
    assert jnp.allclose(out, ref, rtol=1e-5, atol=1e-6), (out, ref)

    # Case 3: ragged element count (2*3*11*13 = 858 = 6*128 + 90):
    # kernel handles the bulk, tiny pure-JAX epilogue handles the tail.
    N, C, H, W = 2, 3, 11, 13
    xr = jax.random.normal(kx, (N, C, H, W), dtype=jnp.float32)
    gr = jax.random.normal(kg, (N, C, H, W), dtype=jnp.float32)
    mr = (jax.random.uniform(km, (N, C, H, W)) > 0.3).astype(jnp.float32)
    out = jax.block_until_ready(pixel_loss(xr, gr, mr, 1))
    ref = ref_loss(xr, gr, mr, 1)
    assert jnp.allclose(out, ref, rtol=1e-5, atol=1e-6), (out, ref)

    print("KERNEL_OK")
</pallas_src>

<mosaic_0001>
module attributes {stable_mosaic.version = 11 : i64} {
  func.func @_pixel_loss_kernel(%arg0: i32, %arg1: i32, %arg2: memref<16x128xf32, #tpu.memory_space<vmem>>, %arg3: memref<16x128xf32, #tpu.memory_space<vmem>>, %arg4: memref<16x128xf32, #tpu.memory_space<vmem>>, %arg5: memref<1x1x128xf32, #tpu.memory_space<vmem>>, %arg6: memref<1x1x128xf32, #tpu.memory_space<vmem>>) attributes {dimension_semantics = [#tpu.dimension_semantics<parallel>, #tpu.dimension_semantics<arbitrary>], iteration_bounds = array<i64: 1, 1>, scalar_prefetch = 0 : i64, scratch_operands = 0 : i64, tpu.core_type = #tpu.core_type<tc>, window_params = [{transform_indices = @transform_0, window_bounds = array<i64: 16, 128>}, {transform_indices = @transform_1, window_bounds = array<i64: 16, 128>}, {transform_indices = @transform_2, window_bounds = array<i64: 16, 128>}, {transform_indices = @transform_3, window_bounds = array<i64: 1, 1, 128>}, {transform_indices = @transform_4, window_bounds = array<i64: 1, 1, 128>}]} {
    %c0_i32 = arith.constant 0 : i32
    %0 = arith.cmpi eq, %arg1, %c0_i32 : i32
    %1 = arith.extui %0 : i1 to i32
    %c0_i32_0 = arith.constant 0 : i32
    %2 = arith.cmpi ne, %1, %c0_i32_0 : i32
    scf.if %2 {
      %cst_19 = arith.constant 0.000000e+00 : f32
      %25 = vector.broadcast %cst_19 : f32 to vector<1x128xf32>
      %c0_20 = arith.constant 0 : index
      %c0_21 = arith.constant 0 : index
      %c0_22 = arith.constant 0 : index
      %26 = vector.load %arg5[%c0_20, %c0_21, %c0_22] : memref<1x1x128xf32, #tpu.memory_space<vmem>>, vector<1x1x128xf32>
      %27 = vector.shape_cast %26 : vector<1x1x128xf32> to vector<1x128xf32>
      %28 = vector.shape_cast %25 : vector<1x128xf32> to vector<1x1x128xf32>
      tpu.vector_store %arg5[%c0_20, %c0_21, %c0_22], %28 {strides = array<i32>} : memref<1x1x128xf32, #tpu.memory_space<vmem>>, vector<1x1x128xf32>,
      %cst_23 = arith.constant 0.000000e+00 : f32
      %29 = vector.broadcast %cst_23 : f32 to vector<1x128xf32>
      %c0_24 = arith.constant 0 : index
      %c0_25 = arith.constant 0 : index
      %c0_26 = arith.constant 0 : index
      %30 = vector.load %arg6[%c0_24, %c0_25, %c0_26] : memref<1x1x128xf32, #tpu.memory_space<vmem>>, vector<1x1x128xf32>
      %31 = vector.shape_cast %30 : vector<1x1x128xf32> to vector<1x128xf32>
      %32 = vector.shape_cast %29 : vector<1x128xf32> to vector<1x1x128xf32>
      tpu.vector_store %arg6[%c0_24, %c0_25, %c0_26], %32 {strides = array<i32>} : memref<1x1x128xf32, #tpu.memory_space<vmem>>, vector<1x1x128xf32>,
    } else {
    }
    %c0 = arith.constant 0 : index
    %c0_1 = arith.constant 0 : index
    %3 = vector.load %arg2[%c0, %c0_1] : memref<16x128xf32, #tpu.memory_space<vmem>>, vector<16x128xf32>
    %c0_2 = arith.constant 0 : index
    %c0_3 = arith.constant 0 : index
    %4 = vector.load %arg3[%c0_2, %c0_3] : memref<16x128xf32, #tpu.memory_space<vmem>>, vector<16x128xf32>
    %c0_4 = arith.constant 0 : index
    %c0_5 = arith.constant 0 : index
    %5 = vector.load %arg4[%c0_4, %c0_5] : memref<16x128xf32, #tpu.memory_space<vmem>>, vector<16x128xf32>
    %6 = arith.subf %3, %4 : vector<16x128xf32>
    %7 = arith.mulf %6, %5 : vector<16x128xf32>
    %8 = math.absf %7 : vector<16x128xf32>
    %c0_6 = arith.constant 0 : index
    %c0_7 = arith.constant 0 : index
    %c0_8 = arith.constant 0 : index
    %9 = vector.load %arg5[%c0_6, %c0_7, %c0_8] : memref<1x1x128xf32, #tpu.memory_space<vmem>>, vector<1x1x128xf32>
    %10 = vector.shape_cast %9 : vector<1x1x128xf32> to vector<1x128xf32>
    %cst = arith.constant dense<0.000000e+00> : vector<128xf32>
    %11 = vector.multi_reduction <add>, %8, %cst [0] : vector<16x128xf32> to vector<128xf32>
    %12 = vector.shape_cast %11 : vector<128xf32> to vector<1x128xf32>
    %13 = arith.addf %10, %12 : vector<1x128xf32>
    %c0_9 = arith.constant 0 : index
    %c0_10 = arith.constant 0 : index
    %c0_11 = arith.constant 0 : index
    %14 = vector.load %arg5[%c0_9, %c0_10, %c0_11] : memref<1x1x128xf32, #tpu.memory_space<vmem>>, vector<1x1x128xf32>
    %15 = vector.shape_cast %14 : vector<1x1x128xf32> to vector<1x128xf32>
    %16 = vector.shape_cast %13 : vector<1x128xf32> to vector<1x1x128xf32>
    tpu.vector_store %arg5[%c0_9, %c0_10, %c0_11], %16 {strides = array<i32>} : memref<1x1x128xf32, #tpu.memory_space<vmem>>, vector<1x1x128xf32>,
    %c0_12 = arith.constant 0 : index
    %c0_13 = arith.constant 0 : index
    %c0_14 = arith.constant 0 : index
    %17 = vector.load %arg6[%c0_12, %c0_13, %c0_14] : memref<1x1x128xf32, #tpu.memory_space<vmem>>, vector<1x1x128xf32>
    %18 = vector.shape_cast %17 : vector<1x1x128xf32> to vector<1x128xf32>
    %cst_15 = arith.constant dense<0.000000e+00> : vector<128xf32>
    %19 = vector.multi_reduction <add>, %5, %cst_15 [0] : vector<16x128xf32> to vector<128xf32>
    %20 = vector.shape_cast %19 : vector<128xf32> to vector<1x128xf32>
    %21 = arith.addf %18, %20 : vector<1x128xf32>
    %c0_16 = arith.constant 0 : index
    %c0_17 = arith.constant 0 : index
    %c0_18 = arith.constant 0 : index
    %22 = vector.load %arg6[%c0_16, %c0_17, %c0_18] : memref<1x1x128xf32, #tpu.memory_space<vmem>>, vector<1x1x128xf32>
    %23 = vector.shape_cast %22 : vector<1x1x128xf32> to vector<1x128xf32>
    %24 = vector.shape_cast %21 : vector<1x128xf32> to vector<1x1x128xf32>
    tpu.vector_store %arg6[%c0_16, %c0_17, %c0_18], %24 {strides = array<i32>} : memref<1x1x128xf32, #tpu.memory_space<vmem>>, vector<1x1x128xf32>,
    return
  }
  func.func @transform_0(%arg0: i32, %arg1: i32) -> (i32, i32) {
    %c1_i32 = arith.constant 1 : i32
    %0 = arith.muli %arg0, %c1_i32 : i32
    %1 = arith.addi %0, %arg1 : i32
    %c0_i32 = arith.constant 0 : i32
    %c0_i32_0 = arith.constant 0 : i32
    return %1, %c0_i32 : i32, i32
  }
  func.func @transform_1(%arg0: i32, %arg1: i32) -> (i32, i32) {
    %c1_i32 = arith.constant 1 : i32
    %0 = arith.muli %arg0, %c1_i32 : i32
    %1 = arith.addi %0, %arg1 : i32
    %c0_i32 = arith.constant 0 : i32
    %c0_i32_0 = arith.constant 0 : i32
    return %1, %c0_i32 : i32, i32
  }
  func.func @transform_2(%arg0: i32, %arg1: i32) -> (i32, i32) {
    %c1_i32 = arith.constant 1 : i32
    %0 = arith.muli %arg0, %c1_i32 : i32
    %1 = arith.addi %0, %arg1 : i32
    %c0_i32 = arith.constant 0 : i32
    %c0_i32_0 = arith.constant 0 : i32
    return %1, %c0_i32 : i32, i32
  }
  func.func @transform_3(%arg0: i32, %arg1: i32) -> (i32, i32, i32) {
    %c0_i32 = arith.constant 0 : i32
    %c0_i32_0 = arith.constant 0 : i32
    %c0_i32_1 = arith.constant 0 : i32
    return %arg0, %c0_i32, %c0_i32_0 : i32, i32, i32
  }
  func.func @transform_4(%arg0: i32, %arg1: i32) -> (i32, i32, i32) {
    %c0_i32 = arith.constant 0 : i32
    %c0_i32_0 = arith.constant 0 : i32
    %c0_i32_1 = arith.constant 0 : i32
    return %arg0, %c0_i32, %c0_i32_0 : i32, i32, i32
  }
}

</mosaic_0001>

<bundles_post_ra>
// kernel: pixel_loss.1
= control target key start
LH: loop header
LB: loop body
LE: loop exit
PB: predicated region body
PF: predicated region fallthrough
CT: control target
= control target key end

     0   :  { %v147_v0 = vmov 0.0   ;;  %s209_s3 = inlined_call_operand.vmem [shape: f32[1,1,128], index: 3, kind: output, shape index: {0}]   ;;  %s210_s4 = inlined_call_operand.vmem [shape: f32[1,1,128], index: 4, kind: output, shape index: {1}]   ;;  %s211_s0 = inlined_call_operand.vmem [shape: f32[16,128], index: 0, kind: input, shape index: {}]   ;;  %s212_s1 = inlined_call_operand.vmem [shape: f32[16,128], index: 1, kind: input, shape index: {}]   ;;  %s213_s2 = inlined_call_operand.vmem [shape: f32[16,128], index: 2, kind: input, shape index: {}]  }
   0x1   :  { %86 = vst [vmem:[%s209_s3] sm:$0x1] %v147_v0  ;;  %v88_v1 = vld [vmem:[%s211_s0] sm:$0xff]  ;;  %v89_v2 = vld [vmem:[%s211_s0 + $0x8] sm:$0xff] }
   0x2   :  { %v90_v3 = vld [vmem:[%s212_s1] sm:$0xff]  ;;  %87 = vst [vmem:[%s210_s4] sm:$0x1] %v147_v0  ;;  %v91_v4 = vld [vmem:[%s212_s1 + $0x8] sm:$0xff] }
   0x3   :  { %v92_v5 = vld [vmem:[%s213_s2] sm:$0xff]  ;;  %v93_v6 = vld [vmem:[%s213_s2 + $0x8] sm:$0xff]  ;;  %v94_v7 = vsub.f32 %v88_v1, %v90_v3  ;;  %v95_v8 = vsub.f32 %v89_v2, %v91_v4 }
   0x4   :  { %v111_v9 = vadd.f32 %v93_v6, %v92_v5 }
   0x5   :  { %v96_v10 = vmul.f32 %v94_v7, %v92_v5  ;;  %v97_v11 = vmul.f32 %v95_v8, %v93_v6 }
   0x6   :  { %v112_v12 = vrot.slane %v111_v9, 4 }
   0x7   :  { %v98_v13 = vand.u32 2147483647, %v96_v10  ;;  %v99_v14 = vand.u32 2147483647, %v97_v11 }
   0x8   :  { %v113_v15 = vadd.f32 %v112_v12, %v111_v9  ;;  %v100_v28 = vld [vmem:[%s209_s3] sm:$0x1] }
   0x9   :  { %v101_v16 = vadd.f32 %v99_v14, %v98_v13  ;;  %v110_v22 = vld [vmem:[%s210_s4] sm:$0x1] }
   0xa   :  { %v114_v17 = vrot.slane %v113_v15, 2 }
   0xb   :  { %v102_v18 = vrot.slane %v101_v16, 4 }
   0xc   :  { %v115_v19 = vadd.f32 %v114_v17, %v113_v15 }
   0xd   :  { %v103_v20 = vadd.f32 %v102_v18, %v101_v16 }
   0xe   :  { %v116_v21 = vrot.slane %v115_v19, 1 }
   0xf   :  { %v104_v23 = vrot.slane %v103_v20, 2 }
  0x10   :  { %v117_v24 = vadd.f32 %v116_v21, %v115_v19 }
  0x11   :  { %v105_v25 = vadd.f32 %v104_v23, %v103_v20 }
  0x12   :  { %v118_v26 = vadd.f32 %v117_v24, %v110_v22 }
  0x13   :  { %v106_v27 = vrot.slane %v105_v25, 1 }
  0x14   :  { %119 = vst [vmem:[%s210_s4] sm:$0x1] %v118_v26 }
  0x15   :  { %v107_v29 = vadd.f32 %v106_v27, %v105_v25 }
  0x17   :  { %v108_v30 = vadd.f32 %v107_v29, %v100_v28 }
  0x19   :  { %109 = vst [vmem:[%s209_s3] sm:$0x1] %v108_v30 }

</bundles_post_ra>
